<compile_context>
chip_gen: v5e
topology: v5e:2x2
jax: 0.10.0
libtpu: 0.0.40
codegen_flags: <defaults>
</compile_context>

<pallas_src>
import jax
import jax.numpy as jnp
from jax.experimental import pallas as pl
from jax.experimental.pallas import tpu as pltpu


def _round_up(x, m):
    return ((x + m - 1) // m) * m


def _gemm(a, b, compute_dtype):
    """MXU GEMM: operands cast to compute_dtype, f32 accumulation."""
    return jnp.dot(a.astype(compute_dtype), b.astype(compute_dtype),
                   preferred_element_type=jnp.float32)


def _input_projection(x, w_ih, b_ih, b_hh, compute_dtype):
    """Hoisted parallel GEMM: xp = x @ W_ih^T + (b_ih + b_hh).  (B,S,I)->(B,S,H)."""
    B, S, I = x.shape
    H = w_ih.shape[0]
    xp = (_gemm(x.reshape(B * S, I), w_ih.T, compute_dtype)
          + (b_ih + b_hh).astype(jnp.float32))
    return xp.reshape(B, S, H)


def _make_recurrence_kernel(t_block, unroll, seq2class, seq_len, n_tb):
    """Build the sequential-recurrence kernel body.

    Grid = (batch_blocks, time_blocks); one grid step = t_block timesteps.
      xp_ref    : (t_block, b_block, Hp) f32   x_t @ W_ih^T + (b_ih + b_hh)
      whh_ref   : (Hp, Hp)               W_hh^T (compute dtype, resident, 1-buf)
      out_ref   : seq2seq : (t_block, b_block, Hp) all hidden states
                  seq2class: (b_block, Hp)         final hidden state only
      h_scratch : (b_block, Hp) f32 hidden state carried across time blocks
    """

    def kernel(xp_ref, whh_ref, out_ref, h_scratch):
        t_blk = pl.program_id(1)

        @pl.when(t_blk == 0)
        def _():
            h_scratch[...] = jnp.zeros_like(h_scratch)          # h0 = 0

        whh = whh_ref[...]                                       # resident weight
        t0 = t_blk * t_block

        def step(i, h):
            pre = xp_ref[i] + jnp.dot(h.astype(whh.dtype), whh,
                                      preferred_element_type=jnp.float32)
            h_new = jnp.tanh(pre)                                 # f32 elementwise
            if seq2class:
                # Freeze the state on padded (t >= seq_len) timesteps so the
                # emitted state is exactly h_{S-1}.
                h_new = jnp.where(t0 + i < seq_len, h_new, h)
            else:
                out_ref[i] = h_new.astype(out_ref.dtype)
            return h_new

        h_scratch[...] = jax.lax.fori_loop(0, t_block, step, h_scratch[...],
                                           unroll=unroll)

        if seq2class:
            @pl.when(t_blk == n_tb - 1)
            def _():
                out_ref[...] = h_scratch[...].astype(out_ref.dtype)

    return kernel


def _run_recurrence(xp, w_hh, *, seq2class, t_block=32, batch_blocks=1,
                    mxu_dtype=jnp.bfloat16, h_dtype=jnp.float32):
    """Run the recurrence over pre-projected inputs xp: (B, S, H).

    Returns (B, S, H) hidden states (seq2seq) or (B, H) final state (seq2class).
    """
    B, S, H = xp.shape
    Hp = _round_up(H, 128)                                       # lane dim

    # Sublane multiple: 16 when the hidden writeback is a packed (bf16) tile.
    sub = 16 if jnp.dtype(h_dtype).itemsize < 4 else 8
    batch_blocks = max(1, min(int(batch_blocks), max(1, B // sub)))
    b_block = _round_up(_round_up(B, batch_blocks) // batch_blocks, sub)
    Bp = b_block * batch_blocks

    t_block = max(1, min(int(t_block), S))

    # ---- VMEM budget: derived from the actual buffer counts -----------------
    try:
        vmem_cap = int(pltpu.get_tpu_info().vmem_capacity_bytes)
    except Exception:                       # conservative v7x-sized fallback
        vmem_cap = 64 * 1024 * 1024
    budget = int(vmem_cap * 0.85)
    whh_bytes = Hp * Hp * jnp.dtype(mxu_dtype).itemsize          # single-buffered
    scratch_bytes = b_block * Hp * 4

    def _need(tb):
        blk_in = tb * b_block * Hp * 4                           # double-buffered
        if seq2class:
            blk_out = b_block * Hp * jnp.dtype(h_dtype).itemsize
        else:
            blk_out = tb * b_block * Hp * jnp.dtype(h_dtype).itemsize
        return 2 * blk_in + 2 * blk_out + whh_bytes + scratch_bytes

    while _need(t_block) > budget and t_block > 1:
        t_block = max(1, t_block // 2)
    # TODO(synk): for H so large that even t_block=1 plus a single bf16 W_hh
    # exceeds the budget, split W_hh along its output dim with an inner
    # pltpu.emit_pipeline loop instead of a single resident block.
    vmem_limit = int(min(budget,
                         max(_need(t_block) + 4 * 1024 * 1024, 32 * 1024 * 1024)))

    Sp = _round_up(S, t_block)
    n_tb = Sp // t_block
    unroll = min(8, t_block)

    # ---- pad operands (zero pads keep padded rows/cols exactly zero) --------
    xp_tm = jnp.transpose(xp, (1, 0, 2)).astype(jnp.float32)     # (S, B, H)
    xp_tm = jnp.pad(xp_tm, ((0, Sp - S), (0, Bp - B), (0, Hp - H)))
    whh_t = jnp.zeros((Hp, Hp), jnp.float32).at[:H, :H].set(
        w_hh.T.astype(jnp.float32)).astype(mxu_dtype)

    kernel = _make_recurrence_kernel(t_block, unroll, seq2class, S, n_tb)

    if seq2class:
        out_shape = jax.ShapeDtypeStruct((Bp, Hp), h_dtype)
        out_spec = pl.BlockSpec((b_block, Hp), lambda b, t: (b, 0))
    else:
        out_shape = jax.ShapeDtypeStruct((Sp, Bp, Hp), h_dtype)
        out_spec = pl.BlockSpec((t_block, b_block, Hp), lambda b, t: (t, b, 0))

    out = pl.pallas_call(
        kernel,
        out_shape=out_shape,
        grid_spec=pltpu.PrefetchScalarGridSpec(
            num_scalar_prefetch=0,
            grid=(batch_blocks, n_tb),
            in_specs=[
                pl.BlockSpec((t_block, b_block, Hp), lambda b, t: (t, b, 0)),
                # Constant index map -> keep W_hh^T resident and single-buffered
                # (halves its VMEM footprint; bf16 halves it again).
                pl.BlockSpec((Hp, Hp), lambda b, t: (0, 0),
                             pipeline_mode=pl.Buffered(1)),
            ],
            out_specs=out_spec,
            scratch_shapes=[pltpu.VMEM((b_block, Hp), jnp.float32)],
        ),
        compiler_params=pltpu.CompilerParams(
            dimension_semantics=("parallel", "arbitrary"),
            vmem_limit_bytes=vmem_limit),
    )(xp_tm, whh_t)

    if seq2class:
        return out[:B, :H]
    return jnp.transpose(out[:S, :B, :H], (1, 0, 2))             # (B, S, H)


def rnn_hidden_states(x, w_ih, w_hh, b_ih, b_hh, *, compute_dtype=jnp.bfloat16,
                      h_dtype=jnp.float32, t_block=32, batch_blocks=1):
    """All hidden states of nn.RNN(tanh, batch_first).  (B,S,I) -> (B,S,H)."""
    xp = _input_projection(x, w_ih, b_ih, b_hh, compute_dtype)
    return _run_recurrence(xp, w_hh, seq2class=False, t_block=t_block,
                           batch_blocks=batch_blocks, mxu_dtype=compute_dtype,
                           h_dtype=h_dtype)


def rnn_seq2seq(x, w_ih, w_hh, b_ih, b_hh, w_fc, b_fc, *,
                compute_dtype=jnp.bfloat16, h_dtype=jnp.float32,
                t_block=32, batch_blocks=1):
    """x: (B, S, I) -> (B, S, O).  Matches torch nn.RNN(tanh)+Linear seq2seq."""
    B, S, _ = x.shape
    H = w_ih.shape[0]
    O = w_fc.shape[0]
    h = rnn_hidden_states(x, w_ih, w_hh, b_ih, b_hh, compute_dtype=compute_dtype,
                          h_dtype=h_dtype, t_block=t_block,
                          batch_blocks=batch_blocks)
    # Hoisted FC head: one (B*S, H) x (H, O) GEMM, f32 accumulation.
    out = _gemm(h.reshape(B * S, H), w_fc.T, compute_dtype) \
        + b_fc.astype(jnp.float32)
    return out.reshape(B, S, O)


def rnn_seq2class(x, w_ih, w_hh, b_ih, b_hh, w_fc, b_fc, *,
                  compute_dtype=jnp.bfloat16, t_block=32, batch_blocks=1):
    """x: (B, S, I) -> (B, O).  Last hidden state through the FC head.

    Uses the fast-path kernel that only writes the final hidden state per
    batch block (no (Sp,Bp,Hp) HBM writeback).
    """
    xp = _input_projection(x, w_ih, b_ih, b_hh, compute_dtype)
    h_last = _run_recurrence(xp, w_hh, seq2class=True, t_block=t_block,
                             batch_blocks=batch_blocks, mxu_dtype=compute_dtype,
                             h_dtype=jnp.float32)
    return _gemm(h_last, w_fc.T, compute_dtype) + b_fc.astype(jnp.float32)


def _reference_seq2seq(x, w_ih, w_hh, b_ih, b_hh, w_fc, b_fc):
    """Pure-JAX reference matching torch.nn.RNN(tanh) + Linear."""
    B, S, I = x.shape
    H = w_ih.shape[0]
    h = jnp.zeros((B, H), jnp.float32)
    outs = []
    for t in range(S):
        h = jnp.tanh(x[:, t, :] @ w_ih.T + b_ih + h @ w_hh.T + b_hh)
        outs.append(h @ w_fc.T + b_fc)
    return jnp.stack(outs, axis=1)


if __name__ == "__main__":
    # small shapes consistent with the module's forward
    B, S, I, H, O = 2, 8, 4, 32, 3

    key = jax.random.PRNGKey(0)
    ks = jax.random.split(key, 7)
    # PyTorch nn.RNN / nn.Linear init: U(-1/sqrt(fan), 1/sqrt(fan))
    r = 1.0 / jnp.sqrt(jnp.float32(H))
    w_ih = jax.random.uniform(ks[0], (H, I), jnp.float32, -r, r)
    w_hh = jax.random.uniform(ks[1], (H, H), jnp.float32, -r, r)
    b_ih = jax.random.uniform(ks[2], (H,), jnp.float32, -r, r)
    b_hh = jax.random.uniform(ks[3], (H,), jnp.float32, -r, r)
    w_fc = jax.random.uniform(ks[4], (O, H), jnp.float32, -r, r)
    b_fc = jax.random.uniform(ks[5], (O,), jnp.float32, -r, r)

    x = jax.random.normal(ks[6], (B, S, I), jnp.float32)

    ref = _reference_seq2seq(x, w_ih, w_hh, b_ih, b_hh, w_fc, b_fc)

    # 1) exact f32 path; t_block=4 -> 2 time blocks, exercising the cross-block
    #    hidden-state carry in VMEM scratch.
    out_f32 = jax.block_until_ready(
        rnn_seq2seq(x, w_ih, w_hh, b_ih, b_hh, w_fc, b_fc,
                    compute_dtype=jnp.float32, t_block=4))
    assert out_f32.shape == (B, S, O)
    assert jnp.allclose(out_f32, ref, atol=1e-4, rtol=1e-4)

    # 2) exact f32 seq2class fast path with t_block that does NOT divide S
    #    (Sp=9 > S=8), exercising the padded-timestep freeze guard.
    cls_f32 = jax.block_until_ready(
        rnn_seq2class(x, w_ih, w_hh, b_ih, b_hh, w_fc, b_fc,
                      compute_dtype=jnp.float32, t_block=3))
    assert cls_f32.shape == (B, O)
    assert jnp.allclose(cls_f32, ref[:, -1, :], atol=1e-4, rtol=1e-4)

    # 3) default performance path (bf16 MXU operands, f32 accumulation).
    out_bf16 = jax.block_until_ready(
        rnn_seq2seq(x, w_ih, w_hh, b_ih, b_hh, w_fc, b_fc))
    cls_bf16 = jax.block_until_ready(
        rnn_seq2class(x, w_ih, w_hh, b_ih, b_hh, w_fc, b_fc))
    assert float(jnp.max(jnp.abs(out_bf16 - ref))) < 0.1
    assert float(jnp.max(jnp.abs(cls_bf16 - ref[:, -1, :]))) < 0.1

    # 4) bf16 hidden-state writeback (halves the dominant HBM stream on v5e).
    out_h16 = jax.block_until_ready(
        rnn_seq2seq(x, w_ih, w_hh, b_ih, b_hh, w_fc, b_fc,
                    h_dtype=jnp.bfloat16))
    assert float(jnp.max(jnp.abs(out_h16 - ref))) < 0.1

    print("KERNEL_OK")
</pallas_src>

<mosaic_0001>
module attributes {stable_mosaic.version = 11 : i64} {
  func.func @kernel(%arg0: i32, %arg1: i32, %arg2: memref<4x8x128xf32, #tpu.memory_space<vmem>>, %arg3: memref<128x128xf32, #tpu.memory_space<vmem>>, %arg4: memref<4x8x128xf32, #tpu.memory_space<vmem>>, %arg5: memref<8x128xf32, #tpu.memory_space<vmem>>) attributes {dimension_semantics = [#tpu.dimension_semantics<parallel>, #tpu.dimension_semantics<arbitrary>], iteration_bounds = array<i64: 1, 2>, scalar_prefetch = 0 : i64, scratch_operands = 1 : i64, tpu.core_type = #tpu.core_type<tc>, window_params = [{transform_indices = @transform_0, window_bounds = array<i64: 4, 8, 128>}, {pipeline_mode = #tpu.pipeline_mode<synchronous>, transform_indices = @transform_1, window_bounds = array<i64: 128, 128>}, {transform_indices = @transform_2, window_bounds = array<i64: 4, 8, 128>}]} {
    %c0_i32 = arith.constant 0 : i32
    %0 = arith.cmpi eq, %arg1, %c0_i32 : i32
    %1 = arith.extui %0 : i1 to i32
    %c0_i32_0 = arith.constant 0 : i32
    %2 = arith.cmpi ne, %1, %c0_i32_0 : i32
    scf.if %2 {
      %cst_26 = arith.constant 0.000000e+00 : f32
      %46 = vector.broadcast %cst_26 : f32 to vector<8x128xf32>
      %c0_27 = arith.constant 0 : index
      %c0_28 = arith.constant 0 : index
      %47 = vector.load %arg5[%c0_27, %c0_28] : memref<8x128xf32, #tpu.memory_space<vmem>>, vector<8x128xf32>
      tpu.vector_store %arg5[%c0_27, %c0_28], %46 {strides = array<i32>} : memref<8x128xf32, #tpu.memory_space<vmem>>, vector<8x128xf32>,
    } else {
    }
    %c0 = arith.constant 0 : index
    %c0_1 = arith.constant 0 : index
    %3 = vector.load %arg3[%c0, %c0_1] : memref<128x128xf32, #tpu.memory_space<vmem>>, vector<128x128xf32>
    %c0_2 = arith.constant 0 : index
    %c0_3 = arith.constant 0 : index
    %4 = vector.load %arg5[%c0_2, %c0_3] : memref<8x128xf32, #tpu.memory_space<vmem>>, vector<8x128xf32>
    %c0_i32_4 = arith.constant 0 : i32
    %5 = arith.index_cast %c0_i32_4 : i32 to index
    %c0_5 = arith.constant 0 : index
    %c0_6 = arith.constant 0 : index
    %6 = vector.load %arg2[%5, %c0_5, %c0_6] : memref<4x8x128xf32, #tpu.memory_space<vmem>>, vector<1x8x128xf32>
    %7 = vector.shape_cast %6 : vector<1x8x128xf32> to vector<8x128xf32>
    %cst = arith.constant dense<0.000000e+00> : vector<8x128xf32>
    %8 = tpu.matmul %4, %3, %cst {dimension_numbers = #tpu.dot_dimension_numbers<[1], [0], [0], [1], [0, 0, 1, 1], [], []>} : vector<8x128xf32>, vector<128x128xf32>, vector<8x128xf32> -> vector<8x128xf32>
    %9 = arith.addf %7, %8 : vector<8x128xf32>
    %10 = math.tanh %9 : vector<8x128xf32>
    %11 = arith.index_cast %c0_i32_4 : i32 to index
    %c0_7 = arith.constant 0 : index
    %c0_8 = arith.constant 0 : index
    %12 = vector.load %arg4[%11, %c0_7, %c0_8] : memref<4x8x128xf32, #tpu.memory_space<vmem>>, vector<1x8x128xf32>
    %13 = vector.shape_cast %12 : vector<1x8x128xf32> to vector<8x128xf32>
    %14 = vector.shape_cast %10 : vector<8x128xf32> to vector<1x8x128xf32>
    tpu.vector_store %arg4[%11, %c0_7, %c0_8], %14 {strides = array<i32>} : memref<4x8x128xf32, #tpu.memory_space<vmem>>, vector<1x8x128xf32>,
    %c1_i32 = arith.constant 1 : i32
    %15 = arith.index_cast %c1_i32 : i32 to index
    %c0_9 = arith.constant 0 : index
    %c0_10 = arith.constant 0 : index
    %16 = vector.load %arg2[%15, %c0_9, %c0_10] : memref<4x8x128xf32, #tpu.memory_space<vmem>>, vector<1x8x128xf32>
    %17 = vector.shape_cast %16 : vector<1x8x128xf32> to vector<8x128xf32>
    %cst_11 = arith.constant dense<0.000000e+00> : vector<8x128xf32>
    %18 = tpu.matmul %10, %3, %cst_11 {dimension_numbers = #tpu.dot_dimension_numbers<[1], [0], [0], [1], [0, 0, 1, 1], [], []>} : vector<8x128xf32>, vector<128x128xf32>, vector<8x128xf32> -> vector<8x128xf32>
    %19 = arith.addf %17, %18 : vector<8x128xf32>
    %20 = math.tanh %19 : vector<8x128xf32>
    %21 = arith.index_cast %c1_i32 : i32 to index
    %c0_12 = arith.constant 0 : index
    %c0_13 = arith.constant 0 : index
    %22 = vector.load %arg4[%21, %c0_12, %c0_13] : memref<4x8x128xf32, #tpu.memory_space<vmem>>, vector<1x8x128xf32>
    %23 = vector.shape_cast %22 : vector<1x8x128xf32> to vector<8x128xf32>
    %24 = vector.shape_cast %20 : vector<8x128xf32> to vector<1x8x128xf32>
    tpu.vector_store %arg4[%21, %c0_12, %c0_13], %24 {strides = array<i32>} : memref<4x8x128xf32, #tpu.memory_space<vmem>>, vector<1x8x128xf32>,
    %c2_i32 = arith.constant 2 : i32
    %25 = arith.index_cast %c2_i32 : i32 to index
    %c0_14 = arith.constant 0 : index
    %c0_15 = arith.constant 0 : index
    %26 = vector.load %arg2[%25, %c0_14, %c0_15] : memref<4x8x128xf32, #tpu.memory_space<vmem>>, vector<1x8x128xf32>
    %27 = vector.shape_cast %26 : vector<1x8x128xf32> to vector<8x128xf32>
    %cst_16 = arith.constant dense<0.000000e+00> : vector<8x128xf32>
    %28 = tpu.matmul %20, %3, %cst_16 {dimension_numbers = #tpu.dot_dimension_numbers<[1], [0], [0], [1], [0, 0, 1, 1], [], []>} : vector<8x128xf32>, vector<128x128xf32>, vector<8x128xf32> -> vector<8x128xf32>
    %29 = arith.addf %27, %28 : vector<8x128xf32>
    %30 = math.tanh %29 : vector<8x128xf32>
    %31 = arith.index_cast %c2_i32 : i32 to index
    %c0_17 = arith.constant 0 : index
    %c0_18 = arith.constant 0 : index
    %32 = vector.load %arg4[%31, %c0_17, %c0_18] : memref<4x8x128xf32, #tpu.memory_space<vmem>>, vector<1x8x128xf32>
    %33 = vector.shape_cast %32 : vector<1x8x128xf32> to vector<8x128xf32>
    %34 = vector.shape_cast %30 : vector<8x128xf32> to vector<1x8x128xf32>
    tpu.vector_store %arg4[%31, %c0_17, %c0_18], %34 {strides = array<i32>} : memref<4x8x128xf32, #tpu.memory_space<vmem>>, vector<1x8x128xf32>,
    %c3_i32 = arith.constant 3 : i32
    %35 = arith.index_cast %c3_i32 : i32 to index
    %c0_19 = arith.constant 0 : index
    %c0_20 = arith.constant 0 : index
    %36 = vector.load %arg2[%35, %c0_19, %c0_20] : memref<4x8x128xf32, #tpu.memory_space<vmem>>, vector<1x8x128xf32>
    %37 = vector.shape_cast %36 : vector<1x8x128xf32> to vector<8x128xf32>
    %cst_21 = arith.constant dense<0.000000e+00> : vector<8x128xf32>
    %38 = tpu.matmul %30, %3, %cst_21 {dimension_numbers = #tpu.dot_dimension_numbers<[1], [0], [0], [1], [0, 0, 1, 1], [], []>} : vector<8x128xf32>, vector<128x128xf32>, vector<8x128xf32> -> vector<8x128xf32>
    %39 = arith.addf %37, %38 : vector<8x128xf32>
    %40 = math.tanh %39 : vector<8x128xf32>
    %41 = arith.index_cast %c3_i32 : i32 to index
    %c0_22 = arith.constant 0 : index
    %c0_23 = arith.constant 0 : index
    %42 = vector.load %arg4[%41, %c0_22, %c0_23] : memref<4x8x128xf32, #tpu.memory_space<vmem>>, vector<1x8x128xf32>
    %43 = vector.shape_cast %42 : vector<1x8x128xf32> to vector<8x128xf32>
    %44 = vector.shape_cast %40 : vector<8x128xf32> to vector<1x8x128xf32>
    tpu.vector_store %arg4[%41, %c0_22, %c0_23], %44 {strides = array<i32>} : memref<4x8x128xf32, #tpu.memory_space<vmem>>, vector<1x8x128xf32>,
    %c4_i32 = arith.constant 4 : i32
    %c0_24 = arith.constant 0 : index
    %c0_25 = arith.constant 0 : index
    %45 = vector.load %arg5[%c0_24, %c0_25] : memref<8x128xf32, #tpu.memory_space<vmem>>, vector<8x128xf32>
    tpu.vector_store %arg5[%c0_24, %c0_25], %40 {strides = array<i32>} : memref<8x128xf32, #tpu.memory_space<vmem>>, vector<8x128xf32>,
    return
  }
  func.func @transform_0(%arg0: i32, %arg1: i32) -> (i32, i32, i32) {
    %c0_i32 = arith.constant 0 : i32
    %c0_i32_0 = arith.constant 0 : i32
    return %arg1, %arg0, %c0_i32 : i32, i32, i32
  }
  func.func @transform_1(%arg0: i32, %arg1: i32) -> (i32, i32) {
    %c0_i32 = arith.constant 0 : i32
    %c0_i32_0 = arith.constant 0 : i32
    %c0_i32_1 = arith.constant 0 : i32
    return %c0_i32, %c0_i32_0 : i32, i32
  }
  func.func @transform_2(%arg0: i32, %arg1: i32) -> (i32, i32, i32) {
    %c0_i32 = arith.constant 0 : i32
    %c0_i32_0 = arith.constant 0 : i32
    return %arg1, %arg0, %c0_i32 : i32, i32, i32
  }
}

</mosaic_0001>

<bundles_post_ra>
// kernel: tpu_custom_call.1
= control target key start
LH: loop header
LB: loop body
LE: loop exit
PB: predicated region body
PF: predicated region fallthrough
CT: control target
= control target key end

     0   :  { %7 = vsyncpa [#allocation4], 0  ;;  %s887_s0 = inlined_call_operand.hbm [shape: f32[8,8,128], index: 0, kind: input, shape index: {}]   ;;  %s888_s1 = inlined_call_operand.hbm [shape: f32[128,128], index: 1, kind: input, shape index: {}]   ;;  %s889_s2 = inlined_call_operand.hbm [shape: f32[8,8,128], index: 2, kind: output, shape index: {}]  }
   0x1   :  { %9 = vsyncpa [#allocation4 + $0x1], 0 }
   0x2   :  { %10 = vsyncpa [#allocation7], 0 }
   0x3   :  { %11 = vsyncpa [#allocation5], 0 }
   0x4   :  { %13 = vsyncpa [#allocation5 + $0x1], 0  ;;  %s718_s9 = smov 0   ;;  %s720_s10 = smov 0  }
   0x5   :  { %s722_s11 = smov 0   ;;  %s724_s12 = smov 0  }
   0x6   :  { %s726_s13 = smov 0   ;;  %s728_s14 = smov 0  }
   0x7 LB: > { %s437_s15 = sadd.s32 4294967295, %s695_s14   ;;  %s438_s16 = sadd.s32 4294967294, %s695_s14   ;;  %s695_s14 = sphi %s728_s14, %s19_s14   ;;  %s691_s13 = sphi %s726_s13, %s901_s13   ;;  %s687_s12 = sphi %s724_s12, %s900_s12   ;;  %s683_s11 = sphi %s722_s11, %s899_s11   ;;  %s679_s10 = sphi %s720_s10, %s898_s10   ;;  %s675_s9 = sphi %s718_s9, %s897_s9  }
   0x8   : > { %p53_p0 = scmp.ne.s32.totalorder %s679_s10, %s675_s9  ;;  %p752_p1 = scmp.eq.s32.totalorder %s437_s15, 0 }
   0x9   : > { %p756_p2 = scmp.eq.s32.totalorder %s437_s15, 1  ;;  %p106_p3 = scmp.eq.s32.totalorder %s438_s16, 1 }
   0xa   : > { %p762_p4 = por %p752_p1, %p53_p0  ;;  %p439_p5 = scmp.ge.s32.totalorder %s695_s14, 1 }
   0xb   : > { %p767_p6 = por %p106_p3, %p53_p0  ;;  %p113_p7 = scmp.lt.s32.totalorder %s695_s14, 3 }
   0xc   : > { %s124_s23 = sshll.u32 %s888_s1, 4  ;;  %s697_s25 = smov [#allocation6]   ;;  %s125_s23 = int_to_ptr.hbm [resolvable:$true] %s124_s23 }
   0xd   : > { %p775_p8 = pnand %p439_p5, %p113_p7  ;;  %s126_s26 = sshll.u32 %s697_s25, 4  ;;  %s127_s26 = int_to_ptr.vmem [resolvable:$true] %s126_s26 }
   0xe   : > { %p441_p11 = scmp.ge.s32.totalorder %s695_s14, 2  ;;  %s698_s27 = smov 128  }
   0xf   : > { %p471_p9 = pneg %p775_p8  ;;  %s699_s28 = smov 8  }
  0x10   : > { %s28_s29 = sadd.s32 1, %s691_s13  ;;  %s40_s30 = sadd.s32 1, %s683_s11 }
  0x11   : > { %p472_p10 = pnand %p471_p9, %p752_p1  ;;  %p29_p12 = scmp.ge.s32.totalorder %s28_s29, 2 }
  0x12   : > { %p47_p13 = scmp.ne.s32.totalorder %s683_s11, %s679_s10  ;;  %p48_p0 = scmp.eq.s32.totalorder %s695_s14, 0 }
  0x13   : > { %474 = dma.hbm_to_vmem [thread:$0]  (!%p472_p10), %s125_s23, 2048, %s127_s26, [#allocation7], %s698_s27, %s698_s27, %s699_s28  }
  0x14   : > { %s903_s29 = smov (%p29_p12, %s28_s29), 0  ;;  %p794_p3 = por %p48_p0, %p47_p13 }
  0x15   : > { %p800_p5 = por %p756_p2, %p47_p13  ;;  %s35_s5 = ssub.s32 %s691_s13, %s903_s29 }
  0x16   : > { %p484_p7 = scmp.lt.s32.totalorder %s695_s14, 2  ;;  %p38_p9 = scmp.eq.s32.totalorder %s35_s5, 0 }
  0x17   : > { %s140_s6 = sand.u32 1, %s683_s11   ;;  %s461_s15 = sshll.u32 %s691_s13, 5 }
  0x18   : > { %s442_s7 = sshll.u32 %s140_s6, 5  ;;  %s150_s22 = scalar_lea.hbm %s887_s0, %s461_s15 }
  0x19   : > { %s809_s8 = scalar_select %p38_p9, %s683_s11, %s40_s30  }
  0x1a   : > { %s144_s23 = scalar_lea.vmem [#allocation3], %s442_s7  ;;  %s151_s18 = sshll.u32 %s150_s22, 4  ;;  %s152_s18 = int_to_ptr.hbm [resolvable:$true] %s151_s18 }
  0x1b   : > { %s153_s25 = sshll.u32 %s144_s23, 4  ;;  %p476_p2 = pnand %p484_p7, %p794_p3  ;;  %s154_s25 = int_to_ptr.vmem [resolvable:$true] %s153_s25 }
  0x1c   : > { %s141_s26 = scalar_lea.sflag [#allocation4], %s140_s6  ;;  %165 = sbr.rel (%p775_p8) target bundleno = 634 (0x27a), region = 28 }
  0x1d   : > { %478 = dma.hbm_to_vmem [thread:$0]  (!%p476_p2), %s152_s18, 512, %s154_s25, %s141_s26, %s698_s27, %s698_s27, %s699_s28  }
  0x1e   : > { %s823_s30 = sand.u32 (!%p775_p8), 1, %s679_s10  }
  0x1f   : > { %s446_s5 = sshll.u32 (!%p775_p8), %s823_s30, 5  ;;  %s168_s7 = scalar_lea.sflag (!%p775_p8), [#allocation4], %s823_s30 }
  0x20   : > { %s827_s15 = scalar_lea.vmem (!%p775_p8), [#allocation3], %s446_s5 }
  0x21   : > { %662 = dma.done.wait (%p762_p4), %s168_s7, 512  }
  0x22   : > { %664 = vsyncadd (%p762_p4), %s168_s7, 4294966784 }
  0x23   : > { %666 = dma.done.wait (%p752_p1), [#allocation7], 2048  }
  0x24   : > { %668 = vsyncadd (%p752_p1), [#allocation7], 4294965248  ;;  %s837_s24 = scalar_lea.vmem [#allocation8], %s446_s5  ;;  %p449_p8 = scmp.ne.s32.totalorder %s687_s12, 0 }
  0x26   : > { %203 = sbr.rel (%p449_p8) target bundleno = 45 (0x2d), region = 40 }
  0x2b   : > { %v700_v0 = vmov 0.0  }
  0x2c   : > { %204 = vst [vmem:[#allocation2] sm:$0xff] %v700_v0 }
  0x2d PF: > { %v220_v1 = vld [vmem:[#allocation6 + $0x78] sm:$0xff]  ;;  %v219_v2 = vld [vmem:[#allocation6 + $0x70] sm:$0xff]  ;;  %v218_v3 = vld [vmem:[#allocation6 + $0x68] sm:$0xff]  ;;  %s462_s17 = sshll.u32 %s687_s12, 5  ;;  %s339_s3 = sshll.u32 %s837_s24, 4  ;;  %s340_s3 = int_to_ptr.vmem [resolvable:$true] %s339_s3 }
  0x2e   : > { %223 = vmatpush.msra.mxu0 %v220_v1  ;;  %248 = vmatpush.msra.mxu1 %v220_v1  ;;  %v217_v4 = vld [vmem:[#allocation6 + $0x60] sm:$0xff]  ;;  %v216_v5 = vld [vmem:[#allocation6 + $0x58] sm:$0xff]  ;;  %v215_v6 = vld [vmem:[#allocation6 + $0x50] sm:$0xff]  ;;  %s338_s28 = scalar_lea.hbm %s889_s2, %s462_s17  ;;  %s326_s16 = scalar_lea.sflag [#allocation5], %s823_s30 }
  0x2f   : > { %274 = vmatpush.msra.mxu2 %v220_v1  ;;  %300 = vmatpush.msra.mxu3 %v220_v1  ;;  %v214_v7 = vld [vmem:[#allocation6 + $0x48] sm:$0xff]  ;;  %v213_v8 = vld [vmem:[#allocation6 + $0x40] sm:$0xff]  ;;  %v212_v9 = vld [vmem:[#allocation6 + $0x38] sm:$0xff]  ;;  %s341_s6 = sshll.u32 %s338_s28, 4  ;;  %s629_s25 = scalar_lea.hbm %s889_s2, 64  ;;  %s342_s6 = int_to_ptr.hbm [resolvable:$true] %s341_s6 }
  0x30   : > { %224 = vmatpush.msra.mxu0 %v219_v2  ;;  %249 = vmatpush.msra.mxu1 %v219_v2  ;;  %v211_v10 = vld [vmem:[#allocation6 + $0x30] sm:$0xff]  ;;  %v210_v11 = vld [vmem:[#allocation6 + $0x28] sm:$0xff]  ;;  %v209_v12 = vld [vmem:[#allocation6 + $0x20] sm:$0xff]  ;;  %s623_s21 = sshra.s32 %s342_s6, 4  ;;  %s624_s21 = int_to_ptr.hbm [resolvable:$true] %s623_s21 }
  0x31   : > { %275 = vmatpush.msra.mxu2 %v219_v2  ;;  %301 = vmatpush.msra.mxu3 %v219_v2  ;;  %v208_v13 = vld [vmem:[#allocation6 + $0x18] sm:$0xff]  ;;  %v207_v14 = vld [vmem:[#allocation6 + $0x10] sm:$0xff]  ;;  %v206_v15 = vld [vmem:[#allocation6 + $0x8] sm:$0xff]  ;;  %s625_s22 = scalar_lea.hbm %s624_s21, 32  ;;  %p630_p12 = scmp.lt.s32.totalorder %s624_s21, %s889_s2 }
  0x32   : > { %225 = vmatpush.msra.mxu0 %v218_v3  ;;  %250 = vmatpush.msra.mxu1 %v218_v3  ;;  %v205_v16 = vld [vmem:[#allocation6] sm:$0xff]  ;;  %v450_v22 = vld [vmem:[%s827_s15 + $0x8] sm:$0xff]  ;;  %v452_v26 = vld [vmem:[%s827_s15 + $0x10] sm:$0xff]  ;;  %p626_p1 = scmp.ne.s32.totalorder %s624_s21, %s625_s22  ;;  %p631_p13 = scmp.lt.s32.totalorder %s629_s25, %s625_s22 }
  0x33   : > { %276 = vmatpush.msra.mxu2 %v218_v3  ;;  %302 = vmatpush.msra.mxu3 %v218_v3  ;;  %v221_v17 = vld [vmem:[#allocation2] sm:$0xff]  ;;  %v222_v18 = vld [vmem:[%s827_s15] sm:$0xff] }
  0x34   : > { %226 = vmatpush.msra.mxu0 %v217_v4  ;;  %251 = vmatpush.msra.mxu1 %v217_v4  ;;  %v454_v30 = vld [vmem:[%s827_s15 + $0x18] sm:$0xff]  ;;  %p627_p4 = pnand %p626_p1, %p800_p5  ;;  %p632_p0 = por %p631_p13, %p630_p12 }
  0x35   : > { %277 = vmatpush.msra.mxu2 %v217_v4  ;;  %303 = vmatpush.msra.mxu3 %v217_v4 }
  0x36   : > { %227 = vmatpush.msra.mxu0 %v216_v5  ;;  %252 = vmatpush.msra.mxu1 %v216_v5  ;;  %p628_p10 = pneg %p627_p4 }
  0x37   : > { %278 = vmatpush.msra.mxu2 %v216_v5  ;;  %304 = vmatpush.msra.mxu3 %v216_v5 }
  0x38   : > { %228 = vmatpush.msra.mxu0 %v215_v6  ;;  %253 = vmatpush.msra.mxu1 %v215_v6  ;;  %p633_p3 = pnand %p632_p0, %p628_p10 }
  0x39   : > { %279 = vmatpush.msra.mxu2 %v215_v6  ;;  %305 = vmatpush.msra.mxu3 %v215_v6 }
  0x3a   : > { %229 = vmatpush.msra.mxu0 %v214_v7  ;;  %254 = vmatpush.msra.mxu1 %v214_v7 }
  0x3b   : > { %280 = vmatpush.msra.mxu2 %v214_v7  ;;  %306 = vmatpush.msra.mxu3 %v214_v7 }
  0x3c   : > { %230 = vmatpush.msra.mxu0 %v213_v8  ;;  %255 = vmatpush.msra.mxu1 %v213_v8 }
  0x3d   : > { %281 = vmatpush.msra.mxu2 %v213_v8  ;;  %307 = vmatpush.msra.mxu3 %v213_v8 }
  0x3e   : > { %231 = vmatpush.msra.mxu0 %v212_v9  ;;  %256 = vmatpush.msra.mxu1 %v212_v9 }
  0x3f   : > { %282 = vmatpush.msra.mxu2 %v212_v9  ;;  %308 = vmatpush.msra.mxu3 %v212_v9 }
  0x40   : > { %232 = vmatpush.msra.mxu0 %v211_v10  ;;  %257 = vmatpush.msra.mxu1 %v211_v10 }
  0x41   : > { %283 = vmatpush.msra.mxu2 %v211_v10  ;;  %309 = vmatpush.msra.mxu3 %v211_v10 }
  0x42   : > { %233 = vmatpush.msra.mxu0 %v210_v11  ;;  %258 = vmatpush.msra.mxu1 %v210_v11 }
  0x43   : > { %284 = vmatpush.msra.mxu2 %v210_v11  ;;  %310 = vmatpush.msra.mxu3 %v210_v11 }
  0x44   : > { %234 = vmatpush.msra.mxu0 %v209_v12  ;;  %259 = vmatpush.msra.mxu1 %v209_v12 }
  0x45   : > { %285 = vmatpush.msra.mxu2 %v209_v12  ;;  %311 = vmatpush.msra.mxu3 %v209_v12 }
  0x46   : > { %235 = vmatpush.msra.mxu0 %v208_v13  ;;  %260 = vmatpush.msra.mxu1 %v208_v13 }
  0x47   : > { %286 = vmatpush.msra.mxu2 %v208_v13  ;;  %312 = vmatpush.msra.mxu3 %v208_v13 }
  0x48   : > { %236 = vmatpush.msra.mxu0 %v207_v14  ;;  %261 = vmatpush.msra.mxu1 %v207_v14 }
  0x49   : > { %287 = vmatpush.msra.mxu2 %v207_v14  ;;  %313 = vmatpush.msra.mxu3 %v207_v14 }
  0x4a   : > { %237 = vmatpush.msra.mxu0 %v206_v15  ;;  %262 = vmatpush.msra.mxu1 %v206_v15 }
  0x4b   : > { %288 = vmatpush.msra.mxu2 %v206_v15  ;;  %314 = vmatpush.msra.mxu3 %v206_v15 }
  0x4c   : > { %238 = vmatpush.msra.mxu0 %v205_v16  ;;  %263 = vmatpush.msra.mxu1 %v205_v16 }
  0x4d   : > { %239 = vmatmul.f32.vlgmr.msra.gmra.mxu0 %v221_v17  ;;  %289 = vmatpush.msra.mxu2 %v205_v16 }
  0x4e   : > { %315 = vmatpush.msra.mxu3 %v205_v16 }
  0xca   : > { %v240_v19 = vpop.f32.mrf.mxu0 }
  0xcb   : > { %v243_v20 = vadd.f32 %v240_v19, %v222_v18 }
  0xcd   : > { %541 = vtanh.f32 %v243_v20 }
  0xd3   : > { %v542_v21 = vpop.eup %541 }
  0xd4   : > { %245 = vst [vmem:[%s837_s24] sm:$0xff] %v542_v21  ;;  %264 = vmatmul.f32.vlgmr.msra.gmra.mxu1 %v542_v21 }
 0x151   : > { %v265_v23 = vpop.f32.mrf.mxu1 }
 0x152   : > { %v268_v24 = vadd.f32 %v450_v22, %v265_v23 }
 0x154   : > { %543 = vtanh.f32 %v268_v24 }
 0x15a   : > { %v544_v25 = vpop.eup %543 }
 0x15b   : > { %451 = vst [vmem:[%s837_s24 + $0x8] sm:$0xff] %v544_v25  ;;  %290 = vmatmul.f32.vlgmr.msra.gmra.mxu2 %v544_v25 }
 0x1de   : > { %v291_v27 = vpop.f32.mrf.mxu2 }
 0x1df   : > { %v294_v28 = vadd.f32 %v452_v26, %v291_v27 }
 0x1e1   : > { %545 = vtanh.f32 %v294_v28 }
 0x1e7   : > { %v546_v29 = vpop.eup %545 }
 0x1e8   : > { %453 = vst [vmem:[%s837_s24 + $0x10] sm:$0xff] %v546_v29  ;;  %316 = vmatmul.f32.vlgmr.msra.gmra.mxu3 %v546_v29 }
 0x26b   : > { %v317_v31 = vpop.f32.mrf.mxu3 }
 0x26c   : > { %v320_v32 = vadd.f32 %v454_v30, %v317_v31 }
 0x26e   : > { %547 = vtanh.f32 %v320_v32 }
 0x274   : > { %v548_v33 = vpop.eup %547 }
 0x275   : > { %455 = vst [vmem:[%s837_s24 + $0x18] sm:$0xff] %v548_v33 }
 0x276   : > { %324 = vst [vmem:[#allocation2] sm:$0xff] %v548_v33 }
 0x277   : > { %636 = shalt.err (!%p633_p3)
}
 0x278   : > { %s701_s30 = smov 128   ;;  %s702_s5 = smov 8  }
 0x279   : > { %469 = dma.vmem_to_hbm [thread:$0]  (%p800_p5), %s340_s3, 512, %s342_s6, %s326_s16, %s701_s30, %s701_s30, %s702_s5  }
 0x27a PF: > { %s356_s7 = sand.u32 1, %s675_s9   ;;  %p480_p7 = pnand %p441_p11, %p767_p6 }
 0x27b   : > { %s357_s15 = scalar_lea.sflag [#allocation5], %s356_s7 }
 0x27c   : > { %p481_p9 = pneg %p480_p7 }
 0x27e   : > { %670 = dma.done.wait (%p481_p9), %s357_s15, 512  }
 0x27f   : > { %672 = vsyncadd (%p481_p9), %s357_s15, 4294966784  ;;  %s19_s14 = sadd.s32 1, %s695_s14   ;;  %s897_s9 = smov %s679_s10 }
 0x280   : > { %p16_p2 = scmp.ge.s32.totalorder %s19_s14, 4   ;;  %s898_s10 = smov %s683_s11 }
 0x281   : > { %s899_s11 = smov %s809_s8  ;;  %s900_s12 = smov %s691_s13 }
 0x282   : > { %s901_s13 = smov %s903_s29  ;;  %18 = sbr.rel (!%p16_p2) target bundleno = 7 (0x7), region = 87 }
 0x287   :  { %363 = vsyncpa [#allocation4], 1 }
 0x288   :  { %365 = vsyncpa [#allocation4 + $0x1], 1 }
 0x289   :  { %366 = vsyncpa [#allocation7], 1 }
 0x28a   :  { %367 = vsyncpa [#allocation5], 1 }
 0x28b   :  { %369 = vsyncpa [#allocation5 + $0x1], 1 }

</bundles_post_ra>
